<compile_context>
chip_gen: v7x
topology: tpu7x:2x2x1
jax: 0.10.0
libtpu: 0.0.40
codegen_flags: <defaults>
</compile_context>

<pallas_src>
import jax
import jax.numpy as jnp
from jax.experimental import pallas as pl
from jax.experimental.pallas import tpu as pltpu


def classifier_kernel(pooled_ref, w_ref, b_ref, logits_ref):
    # pooled_ref: (TB, H)  bf16/f32 in VMEM (one batch tile)
    # w_ref:      (H, Lp)  bf16/f32 in VMEM (resident across the grid)
    # b_ref:      (1, Lp)  f32      in VMEM (resident across the grid)
    # logits_ref: (TB, Lp) f32      in VMEM
    # TODO(synk): nn.Dropout is identity at inference; training-mode dropout
    # (scaled Bernoulli masking via pltpu.prng_*) is not implemented here.
    acc = jnp.dot(pooled_ref[...], w_ref[...],
                  preferred_element_type=jnp.float32)
    logits_ref[...] = (acc + b_ref[...]).astype(logits_ref.dtype)


def _round_up(x, m):
    return ((x + m - 1) // m) * m


def prepare_classifier_params(weight_t, bias):
    """One-time (init-time) lane-padding of the Linear parameters.

    weight_t: (H, num_labels) -- transpose of PyTorch nn.Linear.weight.
    bias    : (num_labels,)
    Returns (w_pad (H, Lp), b_pad (1, Lp) f32, num_labels) with Lp a
    multiple of 128 (zero-filled columns). Call this once, outside the
    per-step hot path, so the forward never re-pads the weight.
    """
    H, L = weight_t.shape
    Lp = max(128, _round_up(L, 128))
    w_pad = jnp.zeros((H, Lp), dtype=weight_t.dtype).at[:, :L].set(weight_t)
    b_pad = jnp.zeros((1, Lp), dtype=jnp.float32).at[0, :L].set(
        bias.astype(jnp.float32))
    return w_pad, b_pad, L


def _choose_batch_tile(B):
    """Batch tile: big enough to amortize per-step overhead, >=2 steps when
    possible so the 'parallel' batch axis shards across v7x's two TCs."""
    if B <= 16:
        return B  # single block equal to the full dim (always layout-legal)
    tb = min(512, _round_up(B, 16))
    if pl.cdiv(B, tb) < 2:
        tb = _round_up(pl.cdiv(B, 2), 16)
    return tb


def classifier_forward(encoder_output, w_pad, b_pad, num_labels):
    """encoder_output = (hidden_state, pooled_output).

    hidden_state : (B, S, H) -- unused by the head (PyTorch module only
                   indexes encoder_output[1]).
    pooled_output: (B, H)    -- kept in its native dtype (e.g. bf16).
    w_pad        : (H, Lp)   -- pre-padded weight from prepare_classifier_params.
    b_pad        : (1, Lp)   -- pre-padded f32 bias.
    returns logits: (B, num_labels) float32
    """
    _hidden_state, pooled_output = encoder_output[0], encoder_output[1]
    B, H = pooled_output.shape
    Lp = w_pad.shape[1]

    TB = _choose_batch_tile(B)
    grid = (pl.cdiv(B, TB),)

    act_bytes = jnp.dtype(pooled_output.dtype).itemsize
    w_bytes = jnp.dtype(w_pad.dtype).itemsize
    cost = pl.CostEstimate(
        flops=2 * B * H * Lp,
        transcendentals=0,
        bytes_accessed=(B * H * act_bytes      # pooled activations (dominant)
                        + H * Lp * w_bytes     # resident weight, read once
                        + Lp * 4               # bias
                        + B * Lp * 4),         # f32 logits writeback
    )

    logits_full = pl.pallas_call(
        classifier_kernel,
        out_shape=jax.ShapeDtypeStruct((B, Lp), jnp.float32),
        grid=grid,
        in_specs=[
            pl.BlockSpec((TB, H), lambda i: (i, 0)),   # batch-tiled pooled
            pl.BlockSpec((H, Lp), lambda i: (0, 0)),   # resident weight
            pl.BlockSpec((1, Lp), lambda i: (0, 0)),   # resident bias
        ],
        out_specs=pl.BlockSpec((TB, Lp), lambda i: (i, 0)),
        compiler_params=pltpu.CompilerParams(
            dimension_semantics=("parallel",),
        ),
        cost_estimate=cost,
    )(pooled_output, w_pad, b_pad)

    # Lane-dense kernel output; padded label columns are stripped here.
    return logits_full[:, :num_labels]


if __name__ == "__main__":
    # Small, deterministic synthetic config (mirrors encoder.config fields).
    batch = 2
    seq = 8
    hidden_size = 32
    num_labels = 3
    initializer_range = 0.02

    key = jax.random.PRNGKey(0)
    k_hidden, k_pooled, k_w = jax.random.split(key, 3)

    # Synthetic encoder outputs in the model's native (bf16) dtype.
    hidden_state = jax.random.normal(
        k_hidden, (batch, seq, hidden_size), jnp.float32).astype(jnp.bfloat16)
    pooled_output = jax.random.normal(
        k_pooled, (batch, hidden_size), jnp.float32).astype(jnp.bfloat16)
    encoder_output = (hidden_state, pooled_output)

    # Parameter init matching _init_weights: weight ~ N(0, initializer_range),
    # bias = 0. Stored transposed: (hidden_size, num_labels), bf16.
    weight_t = (initializer_range * jax.random.normal(
        k_w, (hidden_size, num_labels), jnp.float32)).astype(jnp.bfloat16)
    bias = jnp.zeros((num_labels,), jnp.float32)

    # One-time parameter prep (outside the per-step hot path).
    w_pad, b_pad, _ = prepare_classifier_params(weight_t, bias)

    forward = jax.jit(
        lambda enc, w, b: classifier_forward(enc, w, b, num_labels))
    logits = forward(encoder_output, w_pad, b_pad)
    jax.block_until_ready(logits)

    # Reference: same bf16 inputs, f32 accumulation (dropout = identity).
    ref = jnp.dot(pooled_output.astype(jnp.float32),
                  weight_t.astype(jnp.float32),
                  precision=jax.lax.Precision.HIGHEST) + bias
    assert logits.shape == (batch, num_labels)
    assert logits.dtype == jnp.float32
    assert jnp.allclose(logits, ref, atol=1e-4, rtol=1e-4)

    print("KERNEL_OK")
</pallas_src>

<mosaic_0001>
module attributes {stable_mosaic.version = 11 : i64} {
  func.func @classifier_kernel(%arg0: i32, %arg1: memref<2x32xbf16, #tpu.memory_space<vmem>>, %arg2: memref<32x128xbf16, #tpu.memory_space<vmem>>, %arg3: memref<1x128xf32, #tpu.memory_space<vmem>>, %arg4: memref<2x128xf32, #tpu.memory_space<vmem>>) attributes {dimension_semantics = [#tpu.dimension_semantics<parallel>], iteration_bounds = array<i64: 1>, scalar_prefetch = 0 : i64, scratch_operands = 0 : i64, tpu.core_type = #tpu.core_type<tc>, window_params = [{transform_indices = @transform_0, window_bounds = array<i64: 2, 32>}, {pipeline_mode = #tpu.pipeline_mode<synchronous>, transform_indices = @transform_1, window_bounds = array<i64: 32, 128>}, {pipeline_mode = #tpu.pipeline_mode<synchronous>, transform_indices = @transform_2, window_bounds = array<i64: 1, 128>}, {transform_indices = @transform_3, window_bounds = array<i64: 2, 128>}]} {
    %c0 = arith.constant 0 : index
    %c0_0 = arith.constant 0 : index
    %0 = vector.load %arg1[%c0, %c0_0] : memref<2x32xbf16, #tpu.memory_space<vmem>>, vector<2x32xbf16>
    %c0_1 = arith.constant 0 : index
    %c0_2 = arith.constant 0 : index
    %1 = vector.load %arg2[%c0_1, %c0_2] : memref<32x128xbf16, #tpu.memory_space<vmem>>, vector<32x128xbf16>
    %cst = arith.constant dense<0.000000e+00> : vector<2x128xf32>
    %2 = tpu.matmul %0, %1, %cst {dimension_numbers = #tpu.dot_dimension_numbers<[1], [0], [0], [1], [0, 0, 1, 1], [], []>} : vector<2x32xbf16>, vector<32x128xbf16>, vector<2x128xf32> -> vector<2x128xf32>
    %c0_3 = arith.constant 0 : index
    %c0_4 = arith.constant 0 : index
    %3 = vector.load %arg3[%c0_3, %c0_4] : memref<1x128xf32, #tpu.memory_space<vmem>>, vector<1x128xf32>
    %4 = vector.broadcast %3 : vector<1x128xf32> to vector<2x128xf32>
    %5 = arith.addf %2, %4 : vector<2x128xf32>
    %c0_5 = arith.constant 0 : index
    %c0_6 = arith.constant 0 : index
    %6 = vector.load %arg4[%c0_5, %c0_6] : memref<2x128xf32, #tpu.memory_space<vmem>>, vector<2x128xf32>
    tpu.vector_store %arg4[%c0_5, %c0_6], %5 {strides = array<i32>} : memref<2x128xf32, #tpu.memory_space<vmem>>, vector<2x128xf32>,
    return
  }
  func.func @transform_0(%arg0: i32) -> (i32, i32) {
    %c0_i32 = arith.constant 0 : i32
    %c0_i32_0 = arith.constant 0 : i32
    return %arg0, %c0_i32 : i32, i32
  }
  func.func @transform_1(%arg0: i32) -> (i32, i32) {
    %c0_i32 = arith.constant 0 : i32
    %c0_i32_0 = arith.constant 0 : i32
    %c0_i32_1 = arith.constant 0 : i32
    return %c0_i32, %c0_i32_0 : i32, i32
  }
  func.func @transform_2(%arg0: i32) -> (i32, i32) {
    %c0_i32 = arith.constant 0 : i32
    %c0_i32_0 = arith.constant 0 : i32
    %c0_i32_1 = arith.constant 0 : i32
    return %c0_i32, %c0_i32_0 : i32, i32
  }
  func.func @transform_3(%arg0: i32) -> (i32, i32) {
    %c0_i32 = arith.constant 0 : i32
    %c0_i32_0 = arith.constant 0 : i32
    return %arg0, %c0_i32 : i32, i32
  }
}

</mosaic_0001>

<bundles_post_ra>
// kernel: _lambda_.1
= control target key start
LH: loop header
LB: loop body
LE: loop exit
PB: predicated region body
PF: predicated region fallthrough
CT: control target
= control target key end

     0   :  { %8 = vsyncpa [#allocation3], 0  ;;  %s296_s0 = inlined_call_operand.hbm [shape: bf16[2,32], index: 0, kind: input, shape index: {}]   ;;  %s297_s1 = inlined_call_operand.hbm [shape: bf16[32,128], index: 1, kind: input, shape index: {}]   ;;  %s298_s2 = inlined_call_operand.vmem [shape: f32[1,128], index: 2, kind: input, shape index: {}]   ;;  %s299_s3 = inlined_call_operand.hbm [shape: f32[2,128], index: 3, kind: output, shape index: {}]  }
   0x1   :  { %9 = vsyncpa [#allocation6], 0 }
   0x2   :  { %10 = vsyncpa [#allocation4], 0  ;;  %s223_s12 = smov [#allocation2]   ;;  %s224_s14 = smov [#allocation5]  }
   0x3   :  { %s17_s13 = sshll.u32 %s223_s12, 4  ;;  %s26_s15 = sshll.u32 %s224_s14, 4  ;;  %s18_s13 = int_to_ptr.vmem [resolvable:$true] %s17_s13  ;;  %s250_s15 = int_to_ptr.vmem [resolvable:$true] %s26_s15 }
   0x4   :  { %s151_s18 = scalar_lea.hbm %s296_s0, 16 }
   0x5   :  { %p152_p0 = scmp.ne.s32.totalorder %s296_s0, %s151_s18  ;;  %p155_p1 = scmp.lt.u32.totalorder %s151_s18, %s296_s0 }
   0x7   :  { %p157_p2 = pnand %p155_p1, %p152_p0 }
   0x9   :  { %160 = shalt.err (!%p157_p2)
}
   0xa   :  { %s161_s23 = scalar_lea.vmem %s18_s13, 16  ;;  %s165_s24 = scalar_lea.vmem %s18_s13, 32 }
   0xb   :  { %p162_p3 = scmp.ne.s32.totalorder %s18_s13, %s161_s23  ;;  %p166_p4 = scmp.lt.s32.totalorder %s18_s13, %s18_s13 }
   0xc   :  { %p167_p5 = scmp.lt.s32.totalorder %s165_s24, %s161_s23 }
   0xe   :  { %p168_p6 = por %p167_p5, %p166_p4 }
  0x10   :  { %p169_p7 = pnand %p168_p6, %p162_p3 }
  0x12   :  { %172 = shalt.err (!%p169_p7)
}
  0x13   :  { %20 = dma.hbm_to_vmem [thread:$0]  %s296_s0, 16, %s18_s13, [#allocation3]  }
  0x14   :  { %s173_s29 = scalar_lea.hbm %s297_s1, 256 }
  0x15   :  { %p174_p8 = scmp.ne.s32.totalorder %s297_s1, %s173_s29  ;;  %p177_p9 = scmp.lt.u32.totalorder %s173_s29, %s297_s1 }
  0x17   :  { %p179_p10 = pnand %p177_p9, %p174_p8 }
  0x19   :  { %182 = shalt.err (!%p179_p10)
}
  0x1a   :  { %s183_s7 = scalar_lea.vmem %s250_s15, 256  ;;  %p188_p12 = scmp.lt.s32.totalorder %s250_s15, %s250_s15 }
  0x1b   :  { %p184_p11 = scmp.ne.s32.totalorder %s250_s15, %s183_s7  ;;  %p189_p13 = scmp.lt.s32.totalorder %s183_s7, %s183_s7 }
  0x1d   :  { %p190_p0 = por %p189_p13, %p188_p12 }
  0x1f   :  { %p191_p1 = pnand %p190_p0, %p184_p11 }
  0x21   :  { %194 = shalt.err (!%p191_p1)
}
  0x22   :  { %s225_s0 = smov 64   ;;  %s226_s8 = smov 4  }
  0x23   :  { %32 = dma.hbm_to_vmem [thread:$0]  %s297_s1, 256, %s250_s15, [#allocation6], %s225_s0, %s225_s0, %s226_s8  }
  0x24   :  { %217 = dma.done.wait [#allocation3], 16  }
  0x25   :  { %218 = vsyncadd [#allocation3], 4294967280 }
  0x26   :  { %219 = dma.done.wait [#allocation6], 256  }
  0x27   :  { %220 = vsyncadd [#allocation6], 4294967040  ;;  %v227_v0 = vmov 0.0   ;;  %vm228_vm0 = vmmov 0   ;;  %v149_v1 = vld [vmem:[#allocation5] sm:$0xff]   ;;  %v150_v2 = vld [vmem:[#allocation5 + $0x8] sm:$0xff]  }
  0x28   :  { %134 = vmatprep.subr.bf16.mxu0 %v227_v0  ;;  %138 = vmatprep.mubr.msk.bf16.mxu0 %vm228_vm0, %v227_v0  ;;  %v42_v3 = vld [vmem:[#allocation2] sm:$0x1]  ;;  %vm66_vm1 = vcmask 261120   ;;  %s229_s1 = smov [#allocation7]  }
  0x29   :  { %135 = vmatpush3.bf16.msra.mxu0 %v149_v1  ;;  %v127_v4 = vld [vmem:[%s298_s2] ss:$0 sm:$0xff]  ;;  %s117_s13 = sshll.u32 %s229_s1, 4  ;;  %s118_s13 = int_to_ptr.vmem [resolvable:$true] %s117_s13 }
  0x2a   :  { %136 = vmatprep.subr.bf16.mxu0 %v227_v0  ;;  %s195_s14 = scalar_lea.vmem %s118_s13, 32  ;;  %p200_p3 = scmp.lt.s32.totalorder %s118_s13, %s118_s13 }
  0x2b   :  { %p196_p2 = scmp.ne.s32.totalorder %s118_s13, %s195_s14  ;;  %p201_p4 = scmp.lt.s32.totalorder %s195_s14, %s195_s14 }
  0x2d   :  { %137 = vmatpush3.bf16.msra.mxu0 %v150_v2  ;;  %p202_p5 = por %p201_p4, %p200_p3 }
  0x2f   :  { %p203_p6 = pnand %p202_p5, %p196_p2 }
  0x30   :  { %139 = vmatmul.mubr.msk.bf16.vlgmr.msra.gmra.mrb[0].mxu0 %vm66_vm1, %v42_v3 }
 0x103   :  { %v104_v5 = vpop.f32.mrb[0].mxu0 }
 0x104   :  { %v105_v6 = vadd.f32 %v127_v4, %v104_v5  ;;  %v140_v7 = vpop.f32.mrb[1].mxu0 }
 0x105   :  { %v107_v8 = vpop.f32.mrb[2].mxu0 }
 0x106   :  { %110 = vst [vmem:[#allocation7] sm:$0x3] %v105_v6  ;;  %v141_v9 = vpop.f32.mrb[3].mxu0 }
 0x107   :  { %206 = shalt.err (!%p203_p6)
}
 0x108   :  { %s207_s2 = scalar_lea.hbm %s299_s3, 32 }
 0x109   :  { %p208_p7 = scmp.ne.s32.totalorder %s299_s3, %s207_s2  ;;  %p211_p8 = scmp.lt.u32.totalorder %s207_s2, %s299_s3 }
 0x10b   :  { %p213_p9 = pnand %p211_p8, %p208_p7 }
 0x10d   :  { %216 = shalt.err (!%p213_p9)
}
 0x10e   :  { %120 = dma.vmem_to_hbm [thread:$0]  %s118_s13, 32, %s299_s3, [#allocation4]  }
 0x10f   :  { %221 = dma.done.wait [#allocation4], 32  }
 0x110   :  { %222 = vsyncadd [#allocation4], 4294967264 }
 0x111   :  { %124 = vsyncpa [#allocation3], 1 }
 0x112   :  { %125 = vsyncpa [#allocation6], 1 }
 0x113   :  { %126 = vsyncpa [#allocation4], 1 }

</bundles_post_ra>
